<compile_context>
chip_gen: v7x
topology: tpu7x:2x2x1
jax: 0.10.0
libtpu: 0.0.40
codegen_flags: <defaults>
</compile_context>

<pallas_src>
import jax
import jax.numpy as jnp
from jax.experimental import pallas as pl
from jax.experimental.pallas import tpu as pltpu


# ---------------------------------------------------------------------------
# Production path: contiguous channel split is metadata-only (free).
# ---------------------------------------------------------------------------
def reshape_2d_3d(x: jax.Array, d: int) -> jax.Array:
    N, C, H, W = x.shape
    assert C % d == 0, f"C={C} must be divisible by d={d}"
    return jnp.reshape(x, (N, C // d, d, H, W))


# ---------------------------------------------------------------------------
# Path A: metadata-only Pallas kernel (zero HBM traffic when x is donated).
# ---------------------------------------------------------------------------
def _alias_noop_kernel(x_ref, o_ref):
    # Output aliases the input (input_output_aliases={0: 0}); there is nothing to move.
    # touch() pins a read+write dependence on the aliased output without emitting any DMA.
    del x_ref
    if hasattr(pltpu, "touch"):
        pltpu.touch(o_ref)


def _alias_identity(x: jax.Array) -> jax.Array:
    return pl.pallas_call(
        _alias_noop_kernel,
        out_shape=jax.ShapeDtypeStruct(x.shape, x.dtype),
        in_specs=[pl.BlockSpec(memory_space=pl.ANY)],   # raw HBM ref, no auto-DMA
        out_specs=pl.BlockSpec(memory_space=pl.ANY),
        input_output_aliases={0: 0},
        compiler_params=pltpu.CompilerParams(has_side_effects=True),
        cost_estimate=pl.CostEstimate(flops=0, transcendentals=0, bytes_accessed=0),
    )(x)


# ---------------------------------------------------------------------------
# Path B: optimized streaming-copy kernel (for callers that must not alias).
# ---------------------------------------------------------------------------
def _copy_kernel(x_ref, o_ref):
    # One lane-dense (block_rows, L) tile: pure streaming copy.
    o_ref[...] = x_ref[...]


def _choose_lane_dense_shape(total: int):
    # Widest lane-dense last dim (multiple of 128) that divides the element count:
    # long contiguous DMA bursts, fewer descriptors, fully unmasked vst.
    for L in (8192, 4096, 2048, 1024, 512, 256, 128):
        if total % L == 0:
            return total // L, L
    return None


def _pick_block_rows(rows: int, L: int, itemsize: int, block_bytes: int) -> int:
    bytes_per_row = L * itemsize
    # Hard layout constraint is sublane=8; packed dtypes want 16 (bf16) / 32 (int8, fp8)
    # row multiples to keep stores unmasked and avoid packed relayouts.
    align = max(8, 32 // max(1, itemsize))
    target = max(1, block_bytes // bytes_per_row)

    if target >= rows:
        block_rows = rows                       # full extent: always a legal block shape
    else:
        block_rows = max(align, (target // align) * align)
        block_rows = min(block_rows, rows)
        # Prefer a block_rows that divides rows exactly -> no masked partial tail block.
        br = block_rows
        while br > align and rows % br != 0:
            br -= align
        if rows % br == 0:
            block_rows = br

    # v7x megacore: ensure >= 2 blocks on the "parallel" axis when it stays legal,
    # so both TensorCores stream.  No-op on single-TC v5e/v6e.
    if block_rows == rows and rows % 2 == 0 and (rows // 2) % align == 0:
        block_rows = rows // 2
    return block_rows


def _streaming_copy_reshape(x, out5d, *, block_bytes, min_bytes, buffer_count):
    total = x.size
    itemsize = jnp.dtype(x.dtype).itemsize
    flat = _choose_lane_dense_shape(total)
    if flat is None or total * itemsize < min_bytes:
        # Not lane-dense-able / tiny: the metadata-only reshape is exact and strictly faster.
        return jnp.reshape(x, out5d)

    rows, L = flat
    block_rows = _pick_block_rows(rows, L, itemsize, block_bytes)
    num_blocks = pl.cdiv(rows, block_rows)

    # Free, contiguous, lane-dense 2-D view (wrapper-side layout plumbing only).
    x_flat = jnp.reshape(x, (rows, L))

    if buffer_count == 2:
        in_spec = pl.BlockSpec((block_rows, L), lambda i: (i, 0))
    else:
        # Optional deeper pipelining (sweep 2 vs 3 on v7x where the two TCs contend for HBM).
        in_spec = pl.BlockSpec((block_rows, L), lambda i: (i, 0),
                               pipeline_mode=pl.Buffered(buffer_count))

    flat_out = pl.pallas_call(
        _copy_kernel,
        out_shape=jax.ShapeDtypeStruct((rows, L), x.dtype),
        grid_spec=pltpu.PrefetchScalarGridSpec(
            num_scalar_prefetch=0,
            grid=(num_blocks,),
            in_specs=[in_spec],
            out_specs=pl.BlockSpec((block_rows, L), lambda i: (i, 0)),
        ),
        compiler_params=pltpu.CompilerParams(
            # Single parallel axis -> Mosaic shards it across both v7x TensorCores.
            dimension_semantics=("parallel",),
            vmem_limit_bytes=40 << 20,
        ),
        cost_estimate=pl.CostEstimate(
            flops=0, transcendentals=0, bytes_accessed=2 * total * itemsize),
        # NOTE: no input_output_aliases here — without donation it would force a third
        # full-tensor pass (defensive copy); a fresh output buffer keeps traffic at 2x.
    )(x_flat)

    return jnp.reshape(flat_out, out5d)


# ---------------------------------------------------------------------------
# Public Pallas wrapper.
# ---------------------------------------------------------------------------
def reshape_2d_3d_pallas(
    x: jax.Array,
    d: int,
    *,
    mode: str = "auto",                   # "auto" | "alias" | "copy"
    block_bytes: int = 4 * 1024 * 1024,   # v7x-friendly; v6e can go 4-8 MiB, v5e fine at 2-4 MiB
    min_copy_bytes: int = 1 * 1024 * 1024,
    buffer_count: int = 2,
) -> jax.Array:
    """Pallas implementation of Reshape2D3D: (N, C, H, W) -> (N, C//d, d, H, W)."""
    N, C, H, W = x.shape
    assert C % d == 0, f"C={C} must be divisible by d={d}"
    out5d = (N, C // d, d, H, W)

    if mode in ("auto", "alias"):
        try:
            # Zero-copy path.  Truly free when x is donated at the jit boundary
            # (jax.jit(..., donate_argnums=...)); otherwise XLA inserts exactly one
            # defensive copy, which still never exceeds the streaming-copy cost.
            return jnp.reshape(_alias_identity(x), out5d)
        except Exception:
            if mode == "alias":
                raise
            # Defensive fallback if the zero-copy lowering is unavailable on this
            # jax/libtpu combination: use the streaming-copy kernel below.

    return _streaming_copy_reshape(
        x, out5d, block_bytes=block_bytes, min_bytes=min_copy_bytes,
        buffer_count=buffer_count)


if __name__ == "__main__":
    key = jax.random.PRNGKey(0)
    N, C, H, W = 2, 4, 16, 16
    d = 2  # Reshape2D3D(d=2)

    x = jax.random.normal(key, (N, C, H, W), dtype=jnp.float32)

    # Reference: torch .view on a contiguous NCHW tensor == row-major reshape.
    ref = jnp.reshape(x, (N, C // d, d, H, W))

    # Primary (zero-copy / aliased) Pallas path.
    out = jax.block_until_ready(reshape_2d_3d_pallas(x, d))
    assert out.shape == (N, C // d, d, H, W), out.shape
    assert out.dtype == x.dtype
    assert bool(jnp.array_equal(out, ref)), "aliased Pallas reshape mismatch vs reference"

    # Streaming-copy Pallas path, exercised explicitly (min_copy_bytes=0 so the
    # copy kernel actually runs on this deliberately small test tensor).
    out_copy = jax.block_until_ready(
        reshape_2d_3d_pallas(x, d, mode="copy", min_copy_bytes=0))
    assert out_copy.shape == (N, C // d, d, H, W), out_copy.shape
    assert bool(jnp.array_equal(out_copy, ref)), "copy-kernel Pallas reshape mismatch vs reference"

    # Production (metadata-only) path.
    out_fast = jax.block_until_ready(reshape_2d_3d(x, d))
    assert bool(jnp.array_equal(out_fast, ref)), "jnp.reshape path mismatch vs reference"

    print("KERNEL_OK")
</pallas_src>

<mosaic_0001>
module attributes {stable_mosaic.version = 11 : i64} {
  func.func @_alias_noop_kernel(%arg0: memref<2x4x16x16xf32, #tpu.memory_space<any>>, %arg1: memref<2x4x16x16xf32, #tpu.memory_space<any>>) attributes {dimension_semantics = [], scalar_prefetch = 0 : i64, scratch_operands = 0 : i64, tpu.core_type = #tpu.core_type<tc>} {
    return
  }
}

module attributes {stable_mosaic.version = 11 : i64} {
  func.func @_copy_kernel(%arg0: i32, %arg1: memref<1x2048xf32, #tpu.memory_space<vmem>>, %arg2: memref<1x2048xf32, #tpu.memory_space<vmem>>) attributes {dimension_semantics = [#tpu.dimension_semantics<parallel>], iteration_bounds = array<i64: 1>, scalar_prefetch = 0 : i64, scratch_operands = 0 : i64, tpu.core_type = #tpu.core_type<tc>, window_params = [{transform_indices = @transform_0, window_bounds = array<i64: 1, 2048>}, {transform_indices = @transform_1, window_bounds = array<i64: 1, 2048>}]} {
    %c0 = arith.constant 0 : index
    %c0_0 = arith.constant 0 : index
    %0 = vector.load %arg1[%c0, %c0_0] : memref<1x2048xf32, #tpu.memory_space<vmem>>, vector<1x2048xf32>
    %c0_1 = arith.constant 0 : index
    %c0_2 = arith.constant 0 : index
    %1 = vector.load %arg2[%c0_1, %c0_2] : memref<1x2048xf32, #tpu.memory_space<vmem>>, vector<1x2048xf32>
    tpu.vector_store %arg2[%c0_1, %c0_2], %0 {strides = array<i32>} : memref<1x2048xf32, #tpu.memory_space<vmem>>, vector<1x2048xf32>,
    return
  }
  func.func @transform_0(%arg0: i32) -> (i32, i32) {
    %c0_i32 = arith.constant 0 : i32
    %c0_i32_0 = arith.constant 0 : i32
    return %arg0, %c0_i32 : i32, i32
  }
  func.func @transform_1(%arg0: i32) -> (i32, i32) {
    %c0_i32 = arith.constant 0 : i32
    %c0_i32_0 = arith.constant 0 : i32
    return %arg0, %c0_i32 : i32, i32
  }
}

</mosaic_0001>

<bundles_post_ra>
// kernel: tpu_custom_call.1
= control target key start
LH: loop header
LB: loop body
LE: loop exit
PB: predicated region body
PF: predicated region fallthrough
CT: control target
= control target key end

     0   :  { %s16_s0 = inlined_call_operand.hbm [shape: f32[2,4,16,16], index: 0, kind: input, shape index: {}, may-alias: {0,1}]   ;;  %s17_s1 = inlined_call_operand.hbm [shape: f32[2,4,16,16], index: 1, kind: output, shape index: {}, may-alias: {0,1}]  }

// kernel: tpu_custom_call.1
= control target key start
LH: loop header
LB: loop body
LE: loop exit
PB: predicated region body
PF: predicated region fallthrough
CT: control target
= control target key end

     0   :  { %6 = vsyncpa [#allocation3], 0  ;;  %s126_s0 = inlined_call_operand.hbm [shape: f32[1,2048], index: 0, kind: input, shape index: {}]   ;;  %s127_s1 = inlined_call_operand.hbm [shape: f32[1,2048], index: 1, kind: output, shape index: {}]  }
   0x1   :  { %7 = vsyncpa [#allocation4], 0  ;;  %s90_s6 = smov [#allocation2]   ;;  %s42_s10 = scalar_lea.hbm %s126_s0, 256 }
   0x2   :  { %s14_s7 = sshll.u32 %s90_s6, 4  ;;  %p43_p0 = scmp.ne.s32.totalorder %s126_s0, %s42_s10  ;;  %s15_s7 = int_to_ptr.vmem [resolvable:$true] %s14_s7 }
   0x3   :  { %p46_p1 = scmp.lt.u32.totalorder %s42_s10, %s126_s0 }
   0x5   :  { %p48_p2 = pnand %p46_p1, %p43_p0 }
   0x7   :  { %51 = shalt.err (!%p48_p2)
}
   0x8   :  { %s52_s15 = scalar_lea.vmem %s15_s7, 256  ;;  %p57_p4 = scmp.lt.s32.totalorder %s15_s7, %s15_s7 }
   0x9   :  { %p53_p3 = scmp.ne.s32.totalorder %s15_s7, %s52_s15  ;;  %p58_p5 = scmp.lt.s32.totalorder %s52_s15, %s52_s15 }
   0xb   :  { %p59_p6 = por %p58_p5, %p57_p4 }
   0xd   :  { %p60_p7 = pnand %p59_p6, %p53_p3 }
   0xf   :  { %63 = shalt.err (!%p60_p7)
}
  0x10   :  { %17 = dma.hbm_to_vmem [thread:$0]  %s126_s0, 256, %s15_s7, [#allocation3]  }
  0x11   :  { %86 = dma.done.wait [#allocation3], 256  }
  0x12   :  { %87 = vsyncadd [#allocation3], 4294967040  ;;  %s91_s18 = smov [#allocation5]   ;;  %v21_v0 = vld [vmem:[#allocation2] sm:$0xff]  ;;  %v22_v1 = vld [vmem:[#allocation2 + $0x8] sm:$0xff] }
  0x13   :  { %s31_s19 = sshll.u32 %s91_s18, 4  ;;  %23 = vst [vmem:[#allocation5] sm:$0xff] %v21_v0  ;;  %24 = vst [vmem:[#allocation5 + $0x8] sm:$0xff] %v22_v1  ;;  %s32_s19 = int_to_ptr.vmem [resolvable:$true] %s31_s19 }
  0x14   :  { %s64_s20 = scalar_lea.vmem %s32_s19, 256  ;;  %p69_p9 = scmp.lt.s32.totalorder %s32_s19, %s32_s19 }
  0x15   :  { %p65_p8 = scmp.ne.s32.totalorder %s32_s19, %s64_s20  ;;  %p70_p10 = scmp.lt.s32.totalorder %s64_s20, %s64_s20 }
  0x17   :  { %p71_p11 = por %p70_p10, %p69_p9 }
  0x19   :  { %p72_p12 = pnand %p71_p11, %p65_p8 }
  0x1b   :  { %75 = shalt.err (!%p72_p12)
}
  0x1c   :  { %s76_s0 = scalar_lea.hbm %s127_s1, 256 }
  0x1d   :  { %p77_p13 = scmp.ne.s32.totalorder %s127_s1, %s76_s0  ;;  %p80_p0 = scmp.lt.u32.totalorder %s76_s0, %s127_s1 }
  0x1f   :  { %p82_p1 = pnand %p80_p0, %p77_p13 }
  0x21   :  { %85 = shalt.err (!%p82_p1)
}
  0x22   :  { %34 = dma.vmem_to_hbm [thread:$0]  %s32_s19, 256, %s127_s1, [#allocation4]  }
  0x23   :  { %88 = dma.done.wait [#allocation4], 256  }
  0x24   :  { %89 = vsyncadd [#allocation4], 4294967040 }
  0x25   :  { %38 = vsyncpa [#allocation3], 1 }
  0x26   :  { %39 = vsyncpa [#allocation4], 1 }

</bundles_post_ra>
